<compile_context>
chip_gen: v6e
topology: v6e:2x2x1
jax: 0.10.0
libtpu: 0.0.40
codegen_flags: <defaults>
</compile_context>

<pallas_src>
import jax
import jax.numpy as jnp
import numpy as np
from jax.experimental import pallas as pl
from jax.experimental.pallas import tpu as pltpu


def _v_kernel(xr_ref, xi_ref, wt_ref, wb_ref, v_ref):
    # Two MXU matmuls, f32 accumulation:
    #   (TM, I) @ (I, TN)  +  (TM, I) @ (I, TN)  ->  (TM, TN)
    acc = jnp.dot(xr_ref[...], wt_ref[...], preferred_element_type=jnp.float32)
    acc = acc + jnp.dot(xi_ref[...], wb_ref[...], preferred_element_type=jnp.float32)
    v_ref[...] = acc.astype(v_ref.dtype)


def _round_up(x, m):
    return ((x + m - 1) // m) * m


# Conservative VMEM budget: v7x has 64 MiB physical / 32 MiB scoped default.
_VMEM_BUDGET = 24 << 20


def _plan_tiles(M, I, N, in_itemsize, out_itemsize):
    """Pick (TM, TN, single_buffer_weights) under a v7x-safe VMEM budget."""

    # ---- TN: output-lane / weight-column tile -------------------------------
    def w_resident_bytes(tn, nbuf):
        return 2 * nbuf * I * tn * in_itemsize  # two packed weight arrays

    if w_resident_bytes(N, 1) <= _VMEM_BUDGET // 3:
        TN = N  # full output width; weights stay fully VMEM-resident
    else:
        # Large-I/O layer: tile the lane axis (multiples of 128) so the resident
        # weight block fits the budget (second "parallel" grid axis over 2O).
        TN = (_VMEM_BUDGET // 3) // (2 * I * in_itemsize)
        TN = max(128, (TN // 128) * 128)
        TN = min(TN, _round_up(N, 128))

    # The weights never change across the grid (constant index_map); when they
    # are big, request single buffering so the reclaimed VMEM buys a larger TM.
    single_buffer_w = w_resident_bytes(TN, 2) > (8 << 20)
    nbuf_w = 1 if single_buffer_w else 2
    w_bytes = w_resident_bytes(TN, nbuf_w)

    # ---- TM: row tile --------------------------------------------------------
    # Double-buffered x_real + x_imag input tiles and the output tile.
    per_row = 2 * 2 * I * in_itemsize + 2 * TN * out_itemsize
    tm_budget = max(8, (_VMEM_BUDGET - w_bytes) // per_row)
    TM = min(4096, tm_budget)  # large row tiles amortize per-grid-step overhead
    if M > 8:
        # Keep at least two row tiles so v7x's two TensorCores both get work
        # (harmless on single-TC v5e/v6e).
        TM = min(TM, _round_up(pl.cdiv(M, 2), 8))
    TM = max(8, (TM // 8) * 8)
    return TM, TN, single_buffer_w


def v_computation(Q, K, x_real, x_imag, W_v, *, compute_dtype=None):
    """Pallas implementation of VComputation.forward.

    Args:
      Q, K: passed through unchanged.
      x_real, x_imag: (B, L, I) float32.
      W_v: (2, I, O) float32.
      compute_dtype: optional (e.g. jnp.bfloat16) to halve HBM traffic; the
        matmul still accumulates in f32 and the output stays x_real.dtype.
    Returns:
      (Q, K, V) with V of shape (B, L, O, 2).
    """
    B, L, I = x_real.shape
    O = W_v.shape[-1]
    M = B * L
    N = 2 * O
    out_dtype = x_real.dtype

    # Free (view) reshapes — no concatenate, no extra HBM pass over x.
    xr = x_real.reshape(M, I)
    xi = x_imag.reshape(M, I)

    # Interleave weight columns (o0_r, o0_i, o1_r, o1_i, ...):
    #   V[:, 2o]   = xr @ w0[:, o] - xi @ w1[:, o]   (real part)
    #   V[:, 2o+1] = xr @ w1[:, o] + xi @ w0[:, o]   (imag part)
    # so the (M, 2O) kernel output reshapes for free into (B, L, O, 2).
    w0, w1 = W_v[0], W_v[1]
    w_top = jnp.stack([w0, w1], axis=-1).reshape(I, N)   # multiplies x_real
    w_bot = jnp.stack([-w1, w0], axis=-1).reshape(I, N)  # multiplies x_imag

    if compute_dtype is not None:
        xr = xr.astype(compute_dtype)
        xi = xi.astype(compute_dtype)
        w_top = w_top.astype(compute_dtype)
        w_bot = w_bot.astype(compute_dtype)

    in_itemsize = jnp.dtype(xr.dtype).itemsize
    out_itemsize = jnp.dtype(out_dtype).itemsize
    TM, TN, single_buffer_w = _plan_tiles(M, I, N, in_itemsize, out_itemsize)

    # Ragged edges (M or N not multiples of the tile) are handled by masking.
    grid = (pl.cdiv(M, TM), pl.cdiv(N, TN))

    w_kwargs = dict(pipeline_mode=pl.Buffered(1)) if single_buffer_w else {}
    in_specs = [
        pl.BlockSpec((TM, I), lambda i, j: (i, 0)),          # x_real row tiles
        pl.BlockSpec((TM, I), lambda i, j: (i, 0)),          # x_imag row tiles
        pl.BlockSpec((I, TN), lambda i, j: (0, j), **w_kwargs),  # W_top (resident)
        pl.BlockSpec((I, TN), lambda i, j: (0, j), **w_kwargs),  # W_bot (resident)
    ]
    out_spec = pl.BlockSpec((TM, TN), lambda i, j: (i, j))

    # Explicit VMEM limit with headroom (default scoped limit can reject the
    # larger TM / resident-weight configurations).
    vmem_need = (2 * 2 * TM * I * in_itemsize              # x tiles, double-buffered
                 + 2 * TM * TN * out_itemsize              # output tile, double-buffered
                 + 2 * (1 if single_buffer_w else 2) * I * TN * in_itemsize)
    vmem_limit = max(4 << 20, min(32 << 20, int(vmem_need * 1.5) + (2 << 20)))

    cost = pl.CostEstimate(
        flops=4 * M * I * N,        # two (M,I)@(I,N) matmuls
        transcendentals=0,
        bytes_accessed=(2 * M * I + 2 * I * N) * in_itemsize + M * N * out_itemsize,
    )

    y = pl.pallas_call(
        _v_kernel,
        out_shape=jax.ShapeDtypeStruct((M, N), out_dtype),
        grid=grid,
        in_specs=in_specs,
        out_specs=out_spec,
        compiler_params=pltpu.CompilerParams(
            dimension_semantics=("parallel", "parallel"),
            vmem_limit_bytes=vmem_limit,
        ),
        cost_estimate=cost,
    )(xr, xi, w_top, w_bot)

    # Interleaved columns make this reshape layout-free (no stack pass over V).
    V = y.reshape(B, L, O, 2)
    return Q, K, V


if __name__ == "__main__":
    # Small shapes consistent with the forward: batch=2, seq=8, in=32, out=64
    # (O=64 -> output last dim 2*O = 128, lane-dense stores).
    B, L, I, O = 2, 8, 32, 64
    key = jax.random.PRNGKey(0)
    kq, kk, kr, ki, kw = jax.random.split(key, 5)

    Q = jax.random.normal(kq, (B, L, I), dtype=jnp.float32)
    K = jax.random.normal(kk, (B, L, I), dtype=jnp.float32)
    x_real = jax.random.normal(kr, (B, L, I), dtype=jnp.float32)
    x_imag = jax.random.normal(ki, (B, L, I), dtype=jnp.float32)
    # Deterministic synthetic parameter W_v of shape (2, I, O).
    W_v = jax.random.normal(kw, (2, I, O), dtype=jnp.float32) * 0.1

    Q_out, K_out, V = jax.block_until_ready(
        jax.jit(v_computation)(Q, K, x_real, x_imag, W_v)
    )

    # Reference in plain JAX (mirrors the PyTorch einsums).
    V_real_ref = jnp.einsum("bli,io->blo", x_real, W_v[0]) - jnp.einsum(
        "bli,io->blo", x_imag, W_v[1]
    )
    V_imag_ref = jnp.einsum("bli,io->blo", x_imag, W_v[0]) + jnp.einsum(
        "bli,io->blo", x_real, W_v[1]
    )
    V_ref = jnp.stack([V_real_ref, V_imag_ref], axis=-1)

    np.testing.assert_allclose(np.asarray(V), np.asarray(V_ref), rtol=1e-5, atol=1e-5)
    np.testing.assert_allclose(np.asarray(Q_out), np.asarray(Q))
    np.testing.assert_allclose(np.asarray(K_out), np.asarray(K))
    assert V.shape == (B, L, O, 2)
    print("KERNEL_OK")
</pallas_src>

<mosaic_0001>
module attributes {stable_mosaic.version = 11 : i64} {
  func.func @_v_kernel(%arg0: i32, %arg1: i32, %arg2: memref<8x32xf32, #tpu.memory_space<vmem>>, %arg3: memref<8x32xf32, #tpu.memory_space<vmem>>, %arg4: memref<32x128xf32, #tpu.memory_space<vmem>>, %arg5: memref<32x128xf32, #tpu.memory_space<vmem>>, %arg6: memref<8x128xf32, #tpu.memory_space<vmem>>) attributes {dimension_semantics = [#tpu.dimension_semantics<parallel>, #tpu.dimension_semantics<parallel>], iteration_bounds = array<i64: 2, 1>, scalar_prefetch = 0 : i64, scratch_operands = 0 : i64, tpu.core_type = #tpu.core_type<tc>, window_params = [{transform_indices = @transform_0, window_bounds = array<i64: 8, 32>}, {transform_indices = @transform_1, window_bounds = array<i64: 8, 32>}, {transform_indices = @transform_2, window_bounds = array<i64: 32, 128>}, {transform_indices = @transform_3, window_bounds = array<i64: 32, 128>}, {transform_indices = @transform_4, window_bounds = array<i64: 8, 128>}]} {
    %c0 = arith.constant 0 : index
    %c0_0 = arith.constant 0 : index
    %0 = vector.load %arg2[%c0, %c0_0] : memref<8x32xf32, #tpu.memory_space<vmem>>, vector<8x32xf32>
    %c0_1 = arith.constant 0 : index
    %c0_2 = arith.constant 0 : index
    %1 = vector.load %arg4[%c0_1, %c0_2] : memref<32x128xf32, #tpu.memory_space<vmem>>, vector<32x128xf32>
    %cst = arith.constant dense<0.000000e+00> : vector<8x128xf32>
    %2 = tpu.matmul %0, %1, %cst {dimension_numbers = #tpu.dot_dimension_numbers<[1], [0], [0], [1], [0, 0, 1, 1], [], []>} : vector<8x32xf32>, vector<32x128xf32>, vector<8x128xf32> -> vector<8x128xf32>
    %c0_3 = arith.constant 0 : index
    %c0_4 = arith.constant 0 : index
    %3 = vector.load %arg3[%c0_3, %c0_4] : memref<8x32xf32, #tpu.memory_space<vmem>>, vector<8x32xf32>
    %c0_5 = arith.constant 0 : index
    %c0_6 = arith.constant 0 : index
    %4 = vector.load %arg5[%c0_5, %c0_6] : memref<32x128xf32, #tpu.memory_space<vmem>>, vector<32x128xf32>
    %cst_7 = arith.constant dense<0.000000e+00> : vector<8x128xf32>
    %5 = tpu.matmul %3, %4, %cst_7 {dimension_numbers = #tpu.dot_dimension_numbers<[1], [0], [0], [1], [0, 0, 1, 1], [], []>} : vector<8x32xf32>, vector<32x128xf32>, vector<8x128xf32> -> vector<8x128xf32>
    %6 = arith.addf %2, %5 : vector<8x128xf32>
    %c0_8 = arith.constant 0 : index
    %c0_9 = arith.constant 0 : index
    %7 = vector.load %arg6[%c0_8, %c0_9] : memref<8x128xf32, #tpu.memory_space<vmem>>, vector<8x128xf32>
    tpu.vector_store %arg6[%c0_8, %c0_9], %6 {strides = array<i32>} : memref<8x128xf32, #tpu.memory_space<vmem>>, vector<8x128xf32>,
    return
  }
  func.func @transform_0(%arg0: i32, %arg1: i32) -> (i32, i32) {
    %c0_i32 = arith.constant 0 : i32
    %c0_i32_0 = arith.constant 0 : i32
    return %arg0, %c0_i32 : i32, i32
  }
  func.func @transform_1(%arg0: i32, %arg1: i32) -> (i32, i32) {
    %c0_i32 = arith.constant 0 : i32
    %c0_i32_0 = arith.constant 0 : i32
    return %arg0, %c0_i32 : i32, i32
  }
  func.func @transform_2(%arg0: i32, %arg1: i32) -> (i32, i32) {
    %c0_i32 = arith.constant 0 : i32
    %c0_i32_0 = arith.constant 0 : i32
    return %c0_i32, %arg1 : i32, i32
  }
  func.func @transform_3(%arg0: i32, %arg1: i32) -> (i32, i32) {
    %c0_i32 = arith.constant 0 : i32
    %c0_i32_0 = arith.constant 0 : i32
    return %c0_i32, %arg1 : i32, i32
  }
  func.func @transform_4(%arg0: i32, %arg1: i32) -> (i32, i32) {
    %c0_i32 = arith.constant 0 : i32
    return %arg0, %arg1 : i32, i32
  }
}

</mosaic_0001>

<bundles_post_ra>
// kernel: v_computation.1
= control target key start
LH: loop header
LB: loop body
LE: loop exit
PB: predicated region body
PF: predicated region fallthrough
CT: control target
= control target key end

     0   :  { %s659_s15 = smov 0   ;;  %s661_s16 = smov 0   ;;  %s719_s0 = inlined_call_operand.vmem [shape: f32[16,32], index: 0, kind: input, shape index: {}]   ;;  %s720_s1 = inlined_call_operand.vmem [shape: f32[16,32], index: 1, kind: input, shape index: {}]   ;;  %s721_s2 = inlined_call_operand.vmem [shape: f32[32,128], index: 2, kind: input, shape index: {}]   ;;  %s722_s3 = inlined_call_operand.vmem [shape: f32[32,128], index: 3, kind: input, shape index: {}]   ;;  %s723_s4 = inlined_call_operand.vmem [shape: f32[16,128], index: 4, kind: output, shape index: {}]  }
   0x1   :  { %s663_s17 = smov 0  }
   0x2 LB: > { %s26_s18 = sadd.s32 1, %s626_s16  ;;  %p542_p0 = scmp.ge.s32.totalorder %s630_s17, 1  ;;  %s630_s17 = sphi %s663_s17, %s14_s17   ;;  %s626_s16 = sphi %s661_s16, %s725_s16   ;;  %s622_s15 = sphi %s659_s15, %s724_s15  }
   0x3   : > { %p28_p1 = scmp.ge.s32.totalorder %s26_s18, 2  ;;  %p202_p2 = scmp.lt.s32.totalorder %s630_s17, 3 }
   0x5   : > { %s727_s18 = smov (%p28_p1, %s26_s18), 0  ;;  %p203_p3 = pnand %p542_p0, %p202_p2 }
   0x6   : > { %p241_p4 = scmp.lt.s32.totalorder (!%p203_p3), %s622_s15, 1 }
   0x7   : > { %206 = sbr.rel (%p203_p3) target bundleno = 218 (0xda), region = 36 }
   0xc   : > { %v273_v0 = vld [vmem:[%s722_s3 + $0x18] sm:$0xff]  ;;  %v632_v2 = vmov 0.0   ;;  %v272_v3 = vld [vmem:[%s722_s3 + $0x10] sm:$0xff]  ;;  %s729_s15 = smov (!%p241_p4, %s622_s15), 1  ;;  %v271_v5 = vld [vmem:[%s722_s3 + $0x8] sm:$0xff]  ;;  %vm274_vm0 = vcmask 261120  }
   0xd   : > { %v268_v1 = vld [vmem:[%s721_s2 + $0x18] sm:$0xff]  ;;  %560 = vmatprep.subr.mxu0 %v632_v2  ;;  %571 = vmatprep.subr.mxu1 %v632_v2  ;;  %v267_v4 = vld [vmem:[%s721_s2 + $0x10] sm:$0xff]  ;;  %v266_v6 = vld [vmem:[%s721_s2 + $0x8] sm:$0xff]  ;;  %s543_s5 = sshll.u32 %s729_s15, 3  ;;  %vm633_vm1 = vmmov 0  }
   0xe   : > { %561 = vmatpush3.msra.mxu0 %v273_v0  ;;  %572 = vmatpush3.msra.mxu1 %v268_v1  ;;  %v270_v7 = vld [vmem:[%s722_s3] sm:$0xff]  ;;  %s248_s10 = scalar_lea.vmem %s720_s1, %s543_s5  ;;  %s244_s13 = scalar_lea.vmem %s719_s0, %s543_s5 }
   0xf   : > { %562 = vmatprep.subr.mxu0 %v632_v2  ;;  %573 = vmatprep.subr.mxu1 %v632_v2  ;;  %v265_v8 = vld [vmem:[%s721_s2] sm:$0xff]  ;;  %s263_s21 = scalar_lea.vmem %s723_s4, %s543_s5 }
  0x10   : > { %563 = vmatpush3.msra.mxu0 %v272_v3  ;;  %574 = vmatpush3.msra.mxu1 %v267_v4  ;;  %v269_v9 = vld [vmem:[%s248_s10] sm:$0xff] }
  0x11   : > { %564 = vmatprep.subr.mxu0 %v632_v2  ;;  %575 = vmatprep.subr.mxu1 %v632_v2  ;;  %v264_v10 = vld [vmem:[%s244_s13] sm:$0xff] }
  0x12   : > { %565 = vmatpush3.msra.mxu0 %v271_v5  ;;  %576 = vmatpush3.msra.mxu1 %v266_v6 }
  0x13   : > { %566 = vmatprep.subr.mxu0 %v632_v2  ;;  %577 = vmatprep.subr.mxu1 %v632_v2 }
  0x14   : > { %567 = vmatpush3.msra.mxu0 %v270_v7  ;;  %568 = vmatprep.mubr.msk.f32.mxu0 %vm633_vm1, %v632_v2 }
  0x15   : > { %578 = vmatpush3.msra.mxu1 %v265_v8  ;;  %579 = vmatprep.mubr.msk.f32.mxu1 %vm633_vm1, %v632_v2 }
  0x16   : > { %569 = vmatmul.mubr.msk.f32.vlgmr.msra.gmra.mxu0 %vm274_vm0, %v269_v9  ;;  %580 = vmatmul.mubr.msk.f32.vlgmr.msra.gmra.mxu1 %vm274_vm0, %v264_v10 }
  0xd6   : > { %v344_v11 = vpop.f32.mrf.mxu0  ;;  %v417_v12 = vpop.f32.mrf.mxu1 }
  0xd7   : > { %v418_v13 = vadd.f32 %v417_v12, %v344_v11 }
  0xd8   : > { %v570_v14 = vpop.f32.mrf.mxu0  ;;  %v581_v15 = vpop.f32.mrf.mxu1 }
  0xd9   : > { %421 = vst [vmem:[%s263_s21] sm:$0xff] %v418_v13 }
  0xda PF: > { %s14_s17 = sadd.s32 1, %s630_s17   ;;  %s724_s15 = smov %s626_s16 }
  0xdb   : > { %p11_p5 = scmp.ge.s32.totalorder %s14_s17, 4   ;;  %s725_s16 = smov %s727_s18 }
  0xdd   :  { %13 = sbr.rel (!%p11_p5) target bundleno = 2 (0x2), region = 75 }

</bundles_post_ra>
